<compile_context>
chip_gen: v7x
topology: tpu7x:2x2x1
jax: 0.10.0
libtpu: 0.0.40
codegen_flags: <defaults>
</compile_context>

<pallas_src>
import jax
import jax.numpy as jnp
from jax.experimental import pallas as pl
from jax.experimental.pallas import tpu as pltpu


def net1_kernel(w1_ref, b1_ref, w2_ref, b2_ref, x_ref, o_ref):
    # x_ref: (2, bs, 128) batch tile in VMEM (feature axis first, batch on sublane+lane).
    # w1_ref (10,), b1_ref (5,), w2_ref (5,), b2_ref (1,): flat f32 params in SMEM.
    x0 = x_ref[0]                            # (bs, 128) input feature 0
    x1 = x_ref[1]                            # (bs, 128) input feature 1

    acc = jnp.zeros_like(x0)                 # (bs, 128) f32 accumulator
    # Hidden width is 5 -> fully unrolled scalar-broadcast FMA chain on the VPU.
    for j in range(5):
        # w1 stored row-major (in, out): w1_ref[j] = w1[0, j], w1_ref[5 + j] = w1[1, j]
        h_j = w1_ref[j] * x0 + w1_ref[5 + j] * x1 + b1_ref[j]
        h_j = jnp.maximum(h_j, 0.0)          # ReLU
        acc = acc + w2_ref[j] * h_j          # fc2 weight

    o_ref[...] = acc + b2_ref[0]             # (bs, 128) dense, unmasked store


def net1_forward(x, w1, b1, w2, b2, *, block_n=131072):
    """x: (N, 2) f32; returns (N, 1) f32, matching torch Net_1.forward."""
    n = x.shape[0]
    # Elements per block: multiple of 128*8 (full (8,128) vreg tiles), capped at block_n.
    bn = min(block_n, max(128, pl.cdiv(n, 128) * 128))
    n_pad = pl.cdiv(n, bn) * bn
    rows = n_pad // 128                      # sublane-chunk count
    bs = bn // 128                           # sublane rows per block

    # Batch-major -> feature-major, zero-padded, folded onto (rows, 128) = (sublane, lane).
    xt = jnp.zeros((2, n_pad), jnp.float32).at[:, :n].set(x.T.astype(jnp.float32))
    xt = xt.reshape(2, rows, 128)

    # Tiny params -> flat f32 arrays read as scalars from SMEM.
    w1f = w1.reshape(-1).astype(jnp.float32)   # (10,) row-major (in, out)
    b1f = b1.reshape(-1).astype(jnp.float32)   # (5,)
    w2f = w2.reshape(-1).astype(jnp.float32)   # (5,)
    b2f = b2.reshape(-1).astype(jnp.float32)   # (1,)

    smem = pl.BlockSpec(memory_space=pltpu.MemorySpace.SMEM)

    yt = pl.pallas_call(
        net1_kernel,
        out_shape=jax.ShapeDtypeStruct((rows, 128), jnp.float32),
        grid=(rows // bs,),
        in_specs=[
            smem, smem, smem, smem,                          # w1, b1, w2, b2 in SMEM
            pl.BlockSpec((2, bs, 128), lambda i: (0, i, 0)), # x tile (2, bs, 128)
        ],
        out_specs=pl.BlockSpec((bs, 128), lambda i: (i, 0)), # dense output slab
        compiler_params=pltpu.CompilerParams(
            dimension_semantics=("parallel",),               # shard batch axis on v7x
        ),
        cost_estimate=pl.CostEstimate(
            flops=n_pad * (2 * 2 * 5 + 2 * 5 * 1),
            transcendentals=0,
            bytes_accessed=12 * n_pad,                       # 8 B in + 4 B out per row
        ),
    )(w1f, b1f, w2f, b2f, xt)

    return yt.reshape(n_pad)[:n].reshape(n, 1)


def init_params(key):
    # Deterministic init mimicking torch.nn.Linear default (U(-1/sqrt(fan_in), +)).
    k1, k2, k3, k4 = jax.random.split(key, 4)
    bound1 = 1.0 / jnp.sqrt(2.0)
    bound2 = 1.0 / jnp.sqrt(5.0)
    w1 = jax.random.uniform(k1, (2, 5), jnp.float32, -bound1, bound1)  # (in, out)
    b1 = jax.random.uniform(k2, (1, 5), jnp.float32, -bound1, bound1)
    w2 = jax.random.uniform(k3, (5, 1), jnp.float32, -bound2, bound2)
    b2 = jax.random.uniform(k4, (1, 1), jnp.float32, -bound2, bound2)
    return w1, b1, w2, b2


if __name__ == "__main__":
    key = jax.random.PRNGKey(0)
    kx, kp = jax.random.split(key)

    batch = 8
    x = jax.random.normal(kx, (batch, 2), jnp.float32)
    w1, b1, w2, b2 = init_params(kp)

    out = jax.block_until_ready(net1_forward(x, w1, b1, w2, b2))

    # Reference check in plain JAX (same semantics as the PyTorch forward).
    ref = jnp.maximum(x @ w1 + b1, 0.0) @ w2 + b2
    assert out.shape == (batch, 1)
    assert jnp.allclose(out, ref, atol=1e-5, rtol=1e-5)

    print("KERNEL_OK")
</pallas_src>

<mosaic_0001>
module attributes {stable_mosaic.version = 11 : i64} {
  func.func @net1_kernel(%arg0: i32, %arg1: memref<10xf32, #tpu.memory_space<smem>>, %arg2: memref<5xf32, #tpu.memory_space<smem>>, %arg3: memref<5xf32, #tpu.memory_space<smem>>, %arg4: memref<1xf32, #tpu.memory_space<smem>>, %arg5: memref<2x1x128xf32, #tpu.memory_space<vmem>>, %arg6: memref<1x128xf32, #tpu.memory_space<vmem>>) attributes {dimension_semantics = [#tpu.dimension_semantics<parallel>], iteration_bounds = array<i64: 1>, scalar_prefetch = 0 : i64, scratch_operands = 0 : i64, tpu.core_type = #tpu.core_type<tc>, window_params = [{transform_indices = @transform_0, window_bounds = array<i64: 10>}, {transform_indices = @transform_1, window_bounds = array<i64: 5>}, {transform_indices = @transform_2, window_bounds = array<i64: 5>}, {transform_indices = @transform_3, window_bounds = array<i64: 1>}, {transform_indices = @transform_4, window_bounds = array<i64: 2, 1, 128>}, {transform_indices = @transform_5, window_bounds = array<i64: 1, 128>}]} {
    %c0 = arith.constant 0 : index
    %c0_0 = arith.constant 0 : index
    %c0_1 = arith.constant 0 : index
    %0 = vector.load %arg5[%c0, %c0_0, %c0_1] : memref<2x1x128xf32, #tpu.memory_space<vmem>>, vector<1x1x128xf32>
    %1 = vector.shape_cast %0 : vector<1x1x128xf32> to vector<1x128xf32>
    %c1 = arith.constant 1 : index
    %c0_2 = arith.constant 0 : index
    %c0_3 = arith.constant 0 : index
    %2 = vector.load %arg5[%c1, %c0_2, %c0_3] : memref<2x1x128xf32, #tpu.memory_space<vmem>>, vector<1x1x128xf32>
    %3 = vector.shape_cast %2 : vector<1x1x128xf32> to vector<1x128xf32>
    %cst = arith.constant 0.000000e+00 : f32
    %4 = vector.broadcast %cst : f32 to vector<1x128xf32>
    %c0_4 = arith.constant 0 : index
    %5 = memref.load %arg1[%c0_4] : memref<10xf32, #tpu.memory_space<smem>>
    %6 = vector.broadcast %5 : f32 to vector<1x128xf32>
    %7 = arith.mulf %6, %1 : vector<1x128xf32>
    %c5 = arith.constant 5 : index
    %8 = memref.load %arg1[%c5] : memref<10xf32, #tpu.memory_space<smem>>
    %9 = vector.broadcast %8 : f32 to vector<1x128xf32>
    %10 = arith.mulf %9, %3 : vector<1x128xf32>
    %11 = arith.addf %7, %10 : vector<1x128xf32>
    %c0_5 = arith.constant 0 : index
    %12 = memref.load %arg2[%c0_5] : memref<5xf32, #tpu.memory_space<smem>>
    %13 = vector.broadcast %12 : f32 to vector<1x128xf32>
    %14 = arith.addf %11, %13 : vector<1x128xf32>
    %cst_6 = arith.constant 0.000000e+00 : f32
    %15 = vector.broadcast %cst_6 : f32 to vector<1x128xf32>
    %16 = arith.maximumf %14, %15 : vector<1x128xf32>
    %c0_7 = arith.constant 0 : index
    %17 = memref.load %arg3[%c0_7] : memref<5xf32, #tpu.memory_space<smem>>
    %18 = vector.broadcast %17 : f32 to vector<1x128xf32>
    %19 = arith.mulf %18, %16 : vector<1x128xf32>
    %20 = arith.addf %4, %19 : vector<1x128xf32>
    %c1_8 = arith.constant 1 : index
    %21 = memref.load %arg1[%c1_8] : memref<10xf32, #tpu.memory_space<smem>>
    %22 = vector.broadcast %21 : f32 to vector<1x128xf32>
    %23 = arith.mulf %22, %1 : vector<1x128xf32>
    %c6 = arith.constant 6 : index
    %24 = memref.load %arg1[%c6] : memref<10xf32, #tpu.memory_space<smem>>
    %25 = vector.broadcast %24 : f32 to vector<1x128xf32>
    %26 = arith.mulf %25, %3 : vector<1x128xf32>
    %27 = arith.addf %23, %26 : vector<1x128xf32>
    %c1_9 = arith.constant 1 : index
    %28 = memref.load %arg2[%c1_9] : memref<5xf32, #tpu.memory_space<smem>>
    %29 = vector.broadcast %28 : f32 to vector<1x128xf32>
    %30 = arith.addf %27, %29 : vector<1x128xf32>
    %cst_10 = arith.constant 0.000000e+00 : f32
    %31 = vector.broadcast %cst_10 : f32 to vector<1x128xf32>
    %32 = arith.maximumf %30, %31 : vector<1x128xf32>
    %c1_11 = arith.constant 1 : index
    %33 = memref.load %arg3[%c1_11] : memref<5xf32, #tpu.memory_space<smem>>
    %34 = vector.broadcast %33 : f32 to vector<1x128xf32>
    %35 = arith.mulf %34, %32 : vector<1x128xf32>
    %36 = arith.addf %20, %35 : vector<1x128xf32>
    %c2 = arith.constant 2 : index
    %37 = memref.load %arg1[%c2] : memref<10xf32, #tpu.memory_space<smem>>
    %38 = vector.broadcast %37 : f32 to vector<1x128xf32>
    %39 = arith.mulf %38, %1 : vector<1x128xf32>
    %c7 = arith.constant 7 : index
    %40 = memref.load %arg1[%c7] : memref<10xf32, #tpu.memory_space<smem>>
    %41 = vector.broadcast %40 : f32 to vector<1x128xf32>
    %42 = arith.mulf %41, %3 : vector<1x128xf32>
    %43 = arith.addf %39, %42 : vector<1x128xf32>
    %c2_12 = arith.constant 2 : index
    %44 = memref.load %arg2[%c2_12] : memref<5xf32, #tpu.memory_space<smem>>
    %45 = vector.broadcast %44 : f32 to vector<1x128xf32>
    %46 = arith.addf %43, %45 : vector<1x128xf32>
    %cst_13 = arith.constant 0.000000e+00 : f32
    %47 = vector.broadcast %cst_13 : f32 to vector<1x128xf32>
    %48 = arith.maximumf %46, %47 : vector<1x128xf32>
    %c2_14 = arith.constant 2 : index
    %49 = memref.load %arg3[%c2_14] : memref<5xf32, #tpu.memory_space<smem>>
    %50 = vector.broadcast %49 : f32 to vector<1x128xf32>
    %51 = arith.mulf %50, %48 : vector<1x128xf32>
    %52 = arith.addf %36, %51 : vector<1x128xf32>
    %c3 = arith.constant 3 : index
    %53 = memref.load %arg1[%c3] : memref<10xf32, #tpu.memory_space<smem>>
    %54 = vector.broadcast %53 : f32 to vector<1x128xf32>
    %55 = arith.mulf %54, %1 : vector<1x128xf32>
    %c8 = arith.constant 8 : index
    %56 = memref.load %arg1[%c8] : memref<10xf32, #tpu.memory_space<smem>>
    %57 = vector.broadcast %56 : f32 to vector<1x128xf32>
    %58 = arith.mulf %57, %3 : vector<1x128xf32>
    %59 = arith.addf %55, %58 : vector<1x128xf32>
    %c3_15 = arith.constant 3 : index
    %60 = memref.load %arg2[%c3_15] : memref<5xf32, #tpu.memory_space<smem>>
    %61 = vector.broadcast %60 : f32 to vector<1x128xf32>
    %62 = arith.addf %59, %61 : vector<1x128xf32>
    %cst_16 = arith.constant 0.000000e+00 : f32
    %63 = vector.broadcast %cst_16 : f32 to vector<1x128xf32>
    %64 = arith.maximumf %62, %63 : vector<1x128xf32>
    %c3_17 = arith.constant 3 : index
    %65 = memref.load %arg3[%c3_17] : memref<5xf32, #tpu.memory_space<smem>>
    %66 = vector.broadcast %65 : f32 to vector<1x128xf32>
    %67 = arith.mulf %66, %64 : vector<1x128xf32>
    %68 = arith.addf %52, %67 : vector<1x128xf32>
    %c4 = arith.constant 4 : index
    %69 = memref.load %arg1[%c4] : memref<10xf32, #tpu.memory_space<smem>>
    %70 = vector.broadcast %69 : f32 to vector<1x128xf32>
    %71 = arith.mulf %70, %1 : vector<1x128xf32>
    %c9 = arith.constant 9 : index
    %72 = memref.load %arg1[%c9] : memref<10xf32, #tpu.memory_space<smem>>
    %73 = vector.broadcast %72 : f32 to vector<1x128xf32>
    %74 = arith.mulf %73, %3 : vector<1x128xf32>
    %75 = arith.addf %71, %74 : vector<1x128xf32>
    %c4_18 = arith.constant 4 : index
    %76 = memref.load %arg2[%c4_18] : memref<5xf32, #tpu.memory_space<smem>>
    %77 = vector.broadcast %76 : f32 to vector<1x128xf32>
    %78 = arith.addf %75, %77 : vector<1x128xf32>
    %cst_19 = arith.constant 0.000000e+00 : f32
    %79 = vector.broadcast %cst_19 : f32 to vector<1x128xf32>
    %80 = arith.maximumf %78, %79 : vector<1x128xf32>
    %c4_20 = arith.constant 4 : index
    %81 = memref.load %arg3[%c4_20] : memref<5xf32, #tpu.memory_space<smem>>
    %82 = vector.broadcast %81 : f32 to vector<1x128xf32>
    %83 = arith.mulf %82, %80 : vector<1x128xf32>
    %84 = arith.addf %68, %83 : vector<1x128xf32>
    %c0_21 = arith.constant 0 : index
    %85 = memref.load %arg4[%c0_21] : memref<1xf32, #tpu.memory_space<smem>>
    %86 = vector.broadcast %85 : f32 to vector<1x128xf32>
    %87 = arith.addf %84, %86 : vector<1x128xf32>
    %c0_22 = arith.constant 0 : index
    %c0_23 = arith.constant 0 : index
    %88 = vector.load %arg6[%c0_22, %c0_23] : memref<1x128xf32, #tpu.memory_space<vmem>>, vector<1x128xf32>
    tpu.vector_store %arg6[%c0_22, %c0_23], %87 {strides = array<i32>} : memref<1x128xf32, #tpu.memory_space<vmem>>, vector<1x128xf32>,
    return
  }
  func.func @transform_0(%arg0: i32) -> i32 {
    %c0_i32 = arith.constant 0 : i32
    %c0_i32_0 = arith.constant 0 : i32
    return %c0_i32 : i32
  }
  func.func @transform_1(%arg0: i32) -> i32 {
    %c0_i32 = arith.constant 0 : i32
    %c0_i32_0 = arith.constant 0 : i32
    return %c0_i32 : i32
  }
  func.func @transform_2(%arg0: i32) -> i32 {
    %c0_i32 = arith.constant 0 : i32
    %c0_i32_0 = arith.constant 0 : i32
    return %c0_i32 : i32
  }
  func.func @transform_3(%arg0: i32) -> i32 {
    %c0_i32 = arith.constant 0 : i32
    %c0_i32_0 = arith.constant 0 : i32
    return %c0_i32 : i32
  }
  func.func @transform_4(%arg0: i32) -> (i32, i32, i32) {
    %c0_i32 = arith.constant 0 : i32
    %c0_i32_0 = arith.constant 0 : i32
    %c0_i32_1 = arith.constant 0 : i32
    return %c0_i32, %arg0, %c0_i32_0 : i32, i32, i32
  }
  func.func @transform_5(%arg0: i32) -> (i32, i32) {
    %c0_i32 = arith.constant 0 : i32
    %c0_i32_0 = arith.constant 0 : i32
    return %arg0, %c0_i32 : i32, i32
  }
}

</mosaic_0001>

<bundles_post_ra>
// kernel: tpu_custom_call.1
= control target key start
LH: loop header
LB: loop body
LE: loop exit
PB: predicated region body
PF: predicated region fallthrough
CT: control target
= control target key end

     0   :  { %11 = vsyncpa [#allocation5], 0  ;;  %s345_s0 = inlined_call_operand.vmem [shape: f32[10], index: 0, kind: input, shape index: {}]   ;;  %s346_s1 = inlined_call_operand.vmem [shape: f32[5], index: 1, kind: input, shape index: {}]   ;;  %s347_s2 = inlined_call_operand.vmem [shape: f32[5], index: 2, kind: input, shape index: {}]   ;;  %s348_s3 = inlined_call_operand.<no memory space> [shape: f32[1], index: 3, kind: input, shape index: {}]   ;;  %s349_s4 = inlined_call_operand.vmem [shape: f32[2,1,128], index: 4, kind: input, shape index: {}]   ;;  %s350_s5 = inlined_call_operand.hbm [shape: f32[1,128], index: 5, kind: output, shape index: {}]  }
   0x1   :  { %12 = vsyncpa [#allocation7], 0  ;;  %s30_s20 = sshll.u32 %s346_s1, 4  ;;  %s31_s20 = int_to_ptr.vmem [resolvable:$true] %s30_s20 }
   0x2   :  { %13 = vsyncpa [#allocation4], 0  ;;  %s20_s23 = sshll.u32 %s345_s0, 4  ;;  %s178_s24 = scalar_lea.vmem %s31_s20, 16  ;;  %s21_s23 = int_to_ptr.vmem [resolvable:$true] %s20_s23 }
   0x3   :  { %p179_p0 = scmp.ne.s32.totalorder %s31_s20, %s178_s24  ;;  %p183_p1 = scmp.lt.s32.totalorder %s31_s20, %s31_s20 }
   0x4   :  { %p184_p2 = scmp.lt.s32.totalorder %s178_s24, %s178_s24 }
   0x6   :  { %p185_p3 = por %p184_p2, %p183_p1 }
   0x8   :  { %p186_p4 = pnand %p185_p3, %p179_p0 }
   0xa   :  { %189 = shalt.err (!%p186_p4)
}
   0xb   :  { %s242_s25 = smov [#allocation6]   ;;  %s190_s26 = scalar_lea.vmem %s21_s23, 16 }
   0xc   :  { %33 = dma.vmem_to_smem %s31_s20, 16, %s242_s25, [#allocation7]  }
   0xd   :  { %p191_p5 = scmp.ne.s32.totalorder %s21_s23, %s190_s26  ;;  %p195_p6 = scmp.lt.s32.totalorder %s21_s23, %s21_s23 }
   0xe   :  { %p196_p7 = scmp.lt.s32.totalorder %s190_s26, %s190_s26 }
  0x10   :  { %p197_p8 = por %p196_p7, %p195_p6 }
  0x12   :  { %p198_p9 = pnand %p197_p8, %p191_p5 }
  0x14   :  { %201 = shalt.err (!%p198_p9)
}
  0x15   :  { %s243_s1 = smov [#allocation3]   ;;  %s40_s28 = sshll.u32 %s347_s2, 4  ;;  %s41_s28 = int_to_ptr.vmem [resolvable:$true] %s40_s28 }
  0x16   :  { %23 = dma.vmem_to_smem %s21_s23, 16, %s243_s1, [#allocation5]  }
  0x17   :  { %s202_s29 = scalar_lea.vmem %s41_s28, 16  ;;  %p207_p11 = scmp.lt.s32.totalorder %s41_s28, %s41_s28 }
  0x18   :  { %p203_p10 = scmp.ne.s32.totalorder %s41_s28, %s202_s29  ;;  %p208_p12 = scmp.lt.s32.totalorder %s202_s29, %s202_s29 }
  0x1a   :  { %p209_p13 = por %p208_p12, %p207_p11 }
  0x1c   :  { %p210_p0 = pnand %p209_p13, %p203_p10 }
  0x1e   :  { %213 = shalt.err (!%p210_p0)
}
  0x1f   :  { %s244_s30 = smov [#allocation8]  }
  0x20   :  { %43 = dma.vmem_to_smem %s41_s28, 16, %s244_s30, [#allocation7]  }
  0x21   :  { %236 = dma.done.wait [#allocation5], 16  }
  0x22   :  { %237 = vsyncadd [#allocation5], 4294967280 }
  0x23   :  { %238 = dma.done.wait [#allocation7], 32  }
  0x24   :  { %239 = vsyncadd [#allocation7], 4294967264 }
  0x25   :  { %57 = sfence }
  0x26   :  { %s61_s6 = sld [smem:[#allocation3]]  ;;  %s157_s7 = sld [smem:[#allocation3 + $0x5]]  ;;  %v58_v0 = vld [vmem:[%s349_s4] sm:$0x1]  ;;  %v156_v1 = vld [vmem:[%s349_s4 + $0x1] sm:$0x1]  ;;  %v137_v55 = vstv %s348_s3 }
  0x27   :  { %s285_s8 = sld [smem:[#allocation6]]  ;;  %s158_s9 = sld [smem:[#allocation3 + $0x1]] }
  0x28   :  { %s287_s2 = sld [smem:[#allocation8]]  ;;  %s159_s10 = sld [smem:[#allocation3 + $0x6]] }
  0x29   :  { %s289_s11 = sld [smem:[#allocation6 + $0x1]]  ;;  %s162_s15 = sld [smem:[#allocation3 + $0x2]] }
  0x2a   :  { %s294_s14 = sld [smem:[#allocation8 + $0x1]]  ;;  %s163_s18 = sld [smem:[#allocation3 + $0x7]] }
  0x2b   :  { %s299_s19 = sld [smem:[#allocation6 + $0x2]]  ;;  %s301_s20 = sld [smem:[#allocation3 + $0x3]] }
  0x2c   :  { %v62_v2 = vstv %s61_s6  ;;  %v65_v4 = vstv %s157_s7  ;;  %s303_s21 = sld [smem:[#allocation3 + $0x8]]  ;;  %s305_s22 = sld [smem:[#allocation6 + $0x3]] }
  0x2d   :  { %v63_v3 = vmul.f32 %v62_v2, %v58_v0  ;;  %v66_v5 = vmul.f32 %v156_v1, %v65_v4  ;;  %v77_v6 = vstv %s158_s9  ;;  %s307_s23 = sld [smem:[#allocation3 + $0x4]]  ;;  %v69_v7 = vstv %s285_s8  ;;  %s310_s4 = sld [smem:[#allocation8 + $0x2]] }
  0x2e   :  { %v78_v8 = vmul.f32 %v77_v6, %v58_v0  ;;  %v80_v9 = vstv %s159_s10  ;;  %s312_s24 = sld [smem:[#allocation3 + $0x9]]  ;;  %s314_s25 = sld [smem:[#allocation6 + $0x4]]  ;;  %v73_v17 = vstv %s287_s2 }
  0x2f   :  { %v67_v10 = vadd.f32 %v66_v5, %v63_v3  ;;  %v81_v11 = vmul.f32 %v156_v1, %v80_v9  ;;  %v92_v12 = vstv %s162_s15  ;;  %v84_v13 = vstv %s289_s11  ;;  %s318_s26 = sld [smem:[#allocation8 + $0x3]]  ;;  %s173_s1 = sld [smem:[#allocation8 + $0x4]] }
  0x30   :  { %v93_v14 = vmul.f32 %v92_v12, %v58_v0  ;;  %v95_v15 = vstv %s163_s18  ;;  %v88_v20 = vstv %s294_s14  ;;  %s245_s28 = smov [#allocation9]  }
  0x31   :  { %v70_v16 = vadd.f32 %v69_v7, %v67_v10  ;;  %v82_v18 = vadd.f32 %v81_v11, %v78_v8  ;;  %v96_v19 = vmul.f32 %v156_v1, %v95_v15  ;;  %v99_v21 = vstv %s299_s19  ;;  %s146_s29 = sshll.u32 %s245_s28, 4  ;;  %s147_s29 = int_to_ptr.vmem [resolvable:$true] %s146_s29 }
  0x32   :  { %v107_v22 = vstv %s301_s20  ;;  %v110_v23 = vstv %s303_s21  ;;  %v114_v29 = vstv %s305_s22  ;;  %s214_s30 = scalar_lea.vmem %s147_s29, 16  ;;  %s218_s6 = scalar_lea.vmem %s147_s29, 32 }
  0x33   :  { %v71_v24 = vmax.f32 %v70_v16, 0.0  ;;  %v85_v25 = vadd.f32 %v84_v13, %v82_v18  ;;  %v97_v26 = vadd.f32 %v96_v19, %v93_v14  ;;  %v108_v27 = vmul.f32 %v107_v22, %v58_v0  ;;  %p215_p1 = scmp.ne.s32.totalorder %s147_s29, %s214_s30  ;;  %p219_p2 = scmp.lt.s32.totalorder %s147_s29, %s147_s29 }
  0x34   :  { %v111_v28 = vmul.f32 %v156_v1, %v110_v23  ;;  %v122_v30 = vstv %s307_s23  ;;  %v125_v31 = vstv %s312_s24  ;;  %v103_v36 = vstv %s310_s4  ;;  %p220_p3 = scmp.lt.s32.totalorder %s218_s6, %s214_s30 }
  0x35   :  { %v74_v32 = vmul.f32 %v73_v17, %v71_v24  ;;  %v86_v33 = vmax.f32 %v85_v25, 0.0  ;;  %v100_v34 = vadd.f32 %v99_v21, %v97_v26  ;;  %v123_v35 = vmul.f32 %v122_v30, %v58_v0 }
  0x36   :  { %v112_v37 = vadd.f32 %v111_v28, %v108_v27  ;;  %v126_v38 = vmul.f32 %v156_v1, %v125_v31  ;;  %v129_v41 = vstv %s314_s25  ;;  %v118_v46 = vstv %s318_s26  ;;  %p221_p4 = por %p220_p3, %p219_p2 }
  0x37   :  { %v89_v39 = vmul.f32 %v88_v20, %v86_v33  ;;  %v101_v40 = vmax.f32 %v100_v34, 0.0  ;;  %v133_v50 = vstv %s173_s1 }
  0x38   :  { %v115_v42 = vadd.f32 %v114_v29, %v112_v37  ;;  %v127_v43 = vadd.f32 %v126_v38, %v123_v35  ;;  %p222_p5 = pnand %p221_p4, %p215_p1 }
  0x39   :  { %v90_v44 = vadd.f32 %v89_v39, %v74_v32  ;;  %v104_v45 = vmul.f32 %v103_v36, %v101_v40 }
  0x3a   :  { %v116_v47 = vmax.f32 %v115_v42, 0.0  ;;  %v130_v48 = vadd.f32 %v129_v41, %v127_v43 }
  0x3b   :  { %v105_v49 = vadd.f32 %v104_v45, %v90_v44 }
  0x3c   :  { %v119_v51 = vmul.f32 %v118_v46, %v116_v47  ;;  %v131_v52 = vmax.f32 %v130_v48, 0.0 }
  0x3e   :  { %v120_v53 = vadd.f32 %v119_v51, %v105_v49  ;;  %v134_v54 = vmul.f32 %v133_v50, %v131_v52 }
  0x40   :  { %v135_v56 = vadd.f32 %v134_v54, %v120_v53 }
  0x42   :  { %v138_v57 = vadd.f32 %v137_v55, %v135_v56 }
  0x44   :  { %139 = vst [vmem:[#allocation9] sm:$0x1] %v138_v57 }
  0x45   :  { %225 = shalt.err (!%p222_p5)
}
  0x46   :  { %s226_s2 = scalar_lea.hbm %s350_s5, 16 }
  0x47   :  { %p227_p6 = scmp.ne.s32.totalorder %s350_s5, %s226_s2  ;;  %p230_p7 = scmp.lt.u32.totalorder %s226_s2, %s350_s5 }
  0x49   :  { %p232_p8 = pnand %p230_p7, %p227_p6 }
  0x4b   :  { %235 = shalt.err (!%p232_p8)
}
  0x4c   :  { %149 = dma.vmem_to_hbm [thread:$0]  %s147_s29, 16, %s350_s5, [#allocation4]  }
  0x4d   :  { %240 = dma.done.wait [#allocation4], 16  }
  0x4e   :  { %241 = vsyncadd [#allocation4], 4294967280 }
  0x4f   :  { %153 = vsyncpa [#allocation4], 1 }
  0x50   :  { %154 = vsyncpa [#allocation5], 1 }
  0x51   :  { %155 = vsyncpa [#allocation7], 1 }

</bundles_post_ra>
